<compile_context>
chip_gen: v7x
topology: tpu7x:2x2x1
jax: 0.10.0
libtpu: 0.0.40
codegen_flags: <defaults>
</compile_context>

<pallas_src>
import jax
import jax.numpy as jnp
from jax.experimental import pallas as pl
from jax.experimental.pallas import tpu as pltpu

IN_F, HID_F, OUT_F = 3, 4, 1
N_PARAMS = IN_F * HID_F + HID_F + HID_F * OUT_F + OUT_F  # 21
LANES = 128  # vreg lane width


def ann_kernel(params_ref, x_ref, o_ref):
    # params_ref: SMEM f32[21] = [w1 (3*4, [in,out] row-major), b1 (4), w2 (4), b2 (1)]
    # x_ref:      VMEM (3, TS, 128) -- feature planes; batch on sublanes+lanes
    # o_ref:      VMEM (TS, 128)
    x0 = x_ref[0]                        # (TS, 128) full-vreg planes
    x1 = x_ref[1]
    x2 = x_ref[2]

    b2 = params_ref[N_PARAMS - 1]
    acc = None
    for j in range(HID_F):               # fully unrolled: 4 hidden units
        w1_0j = params_ref[0 * HID_F + j]            # scalar SMEM reads
        w1_1j = params_ref[1 * HID_F + j]
        w1_2j = params_ref[2 * HID_F + j]
        b1_j = params_ref[IN_F * HID_F + j]
        w2_j = params_ref[IN_F * HID_F + HID_F + j]
        # hidden_j = relu(x . w1[:, j] + b1[j])   (pure VPU on (TS,128) vregs)
        hj = x0 * w1_0j + x1 * w1_1j + x2 * w1_2j + b1_j
        hj = jnp.maximum(hj, 0.0)
        if acc is None:
            acc = hj * w2_j + b2          # fold b2 into the first term
        else:
            acc = acc + hj * w2_j
    o_ref[...] = acc                      # full (TS,128) unmasked store


def ann_forward(x, w1, b1, w2, b2, *, ts=None):
    """x: (B, 3); w1: (3, 4) [in,out]; b1: (4,); w2: (4, 1); b2: (1,). Returns (B, 1)."""
    B = x.shape[0]
    r_total = pl.cdiv(B, LANES)          # rows of 128 samples needed
    if ts is None:
        # ~2048 rows/step (3 MiB input block, ~8 MiB double-buffered in+out,
        # comfortably under v7x's 32 MiB scoped VMEM). For big batches keep
        # >= 4 grid steps so v7x's two TensorCores both get >= 2 steps.
        ts = min(2048, max(8, ((pl.cdiv(r_total, 4) + 7) // 8) * 8))
    n_tiles = pl.cdiv(r_total, ts)
    r_pad = n_tiles * ts
    Bp = r_pad * LANES

    # Feature-major, zero-padded layout: (3, r_pad, 128). The reshape from
    # (3, Bp) is layout-free; the only wrapper data movement is one pad+transpose.
    # TODO(synk): have the producer emit feature-major activations to also
    # eliminate this wrapper-side transpose for a fully HBM-bound pipeline.
    xT = jnp.pad(x.astype(jnp.float32).T, ((0, 0), (0, Bp - B)))
    xT3 = xT.reshape(IN_F, r_pad, LANES)

    # One flat parameter vector (lives in SMEM inside the kernel).
    params = jnp.concatenate(
        [w1.reshape(-1), b1.reshape(-1), w2.reshape(-1), b2.reshape(-1)]
    ).astype(jnp.float32)                # f32[21]

    out = pl.pallas_call(
        ann_kernel,
        out_shape=jax.ShapeDtypeStruct((r_pad, LANES), jnp.float32),
        grid=(n_tiles,),
        in_specs=[
            pl.BlockSpec(memory_space=pltpu.MemorySpace.SMEM),     # packed params
            pl.BlockSpec((IN_F, ts, LANES), lambda i: (0, i, 0)),  # x tile
        ],
        out_specs=pl.BlockSpec((ts, LANES), lambda i: (i, 0)),
        compiler_params=pltpu.CompilerParams(
            dimension_semantics=("parallel",)),                    # megacore split on v7x
    )(params, xT3)

    # Padded samples compute relu(b1).w2 + b2 (not zero): slice them off here
    # and never reduce over them downstream.
    return out.reshape(Bp)[:B].reshape(B, OUT_F)


def init_params(key):
    # Deterministic init mimicking nn.Linear's uniform(-1/sqrt(fan_in), 1/sqrt(fan_in)).
    k1, k2, k3, k4 = jax.random.split(key, 4)
    bound1 = 1.0 / jnp.sqrt(3.0)
    bound2 = 1.0 / jnp.sqrt(4.0)
    w1 = jax.random.uniform(k1, (IN_F, HID_F), jnp.float32, -bound1, bound1)   # [in, out]
    b1 = jax.random.uniform(k2, (HID_F,), jnp.float32, -bound1, bound1)
    w2 = jax.random.uniform(k3, (HID_F, OUT_F), jnp.float32, -bound2, bound2)  # [in, out]
    b2 = jax.random.uniform(k4, (OUT_F,), jnp.float32, -bound2, bound2)
    return w1, b1, w2, b2


if __name__ == "__main__":
    key = jax.random.PRNGKey(0)
    kx, kx2, kp = jax.random.split(key, 3)
    w1, b1, w2, b2 = init_params(kp)

    ok = True
    for xs in [
        jax.random.normal(kx, (8, IN_F), dtype=jnp.float32),      # tiny batch
        jax.random.normal(kx2, (300, IN_F), dtype=jnp.float32),   # ragged (not a lane multiple)
    ]:
        out = jax.block_until_ready(ann_forward(xs, w1, b1, w2, b2))
        ref = jnp.maximum(xs @ w1 + b1, 0.0) @ w2 + b2
        ok &= out.shape == (xs.shape[0], OUT_F)
        ok &= bool(jnp.allclose(out, ref, atol=1e-5))

    assert ok, "mismatch vs reference"
    print("KERNEL_OK")
</pallas_src>

<mosaic_0001>
module attributes {stable_mosaic.version = 11 : i64} {
  func.func @ann_kernel(%arg0: i32, %arg1: memref<21xf32, #tpu.memory_space<smem>>, %arg2: memref<3x8x128xf32, #tpu.memory_space<vmem>>, %arg3: memref<8x128xf32, #tpu.memory_space<vmem>>) attributes {dimension_semantics = [#tpu.dimension_semantics<parallel>], iteration_bounds = array<i64: 1>, scalar_prefetch = 0 : i64, scratch_operands = 0 : i64, tpu.core_type = #tpu.core_type<tc>, window_params = [{transform_indices = @transform_0, window_bounds = array<i64: 21>}, {transform_indices = @transform_1, window_bounds = array<i64: 3, 8, 128>}, {transform_indices = @transform_2, window_bounds = array<i64: 8, 128>}]} {
    %c0 = arith.constant 0 : index
    %c0_0 = arith.constant 0 : index
    %c0_1 = arith.constant 0 : index
    %0 = vector.load %arg2[%c0, %c0_0, %c0_1] : memref<3x8x128xf32, #tpu.memory_space<vmem>>, vector<1x8x128xf32>
    %1 = vector.shape_cast %0 : vector<1x8x128xf32> to vector<8x128xf32>
    %c1 = arith.constant 1 : index
    %c0_2 = arith.constant 0 : index
    %c0_3 = arith.constant 0 : index
    %2 = vector.load %arg2[%c1, %c0_2, %c0_3] : memref<3x8x128xf32, #tpu.memory_space<vmem>>, vector<1x8x128xf32>
    %3 = vector.shape_cast %2 : vector<1x8x128xf32> to vector<8x128xf32>
    %c2 = arith.constant 2 : index
    %c0_4 = arith.constant 0 : index
    %c0_5 = arith.constant 0 : index
    %4 = vector.load %arg2[%c2, %c0_4, %c0_5] : memref<3x8x128xf32, #tpu.memory_space<vmem>>, vector<1x8x128xf32>
    %5 = vector.shape_cast %4 : vector<1x8x128xf32> to vector<8x128xf32>
    %c20 = arith.constant 20 : index
    %6 = memref.load %arg1[%c20] : memref<21xf32, #tpu.memory_space<smem>>
    %c0_6 = arith.constant 0 : index
    %7 = memref.load %arg1[%c0_6] : memref<21xf32, #tpu.memory_space<smem>>
    %c4 = arith.constant 4 : index
    %8 = memref.load %arg1[%c4] : memref<21xf32, #tpu.memory_space<smem>>
    %c8 = arith.constant 8 : index
    %9 = memref.load %arg1[%c8] : memref<21xf32, #tpu.memory_space<smem>>
    %c12 = arith.constant 12 : index
    %10 = memref.load %arg1[%c12] : memref<21xf32, #tpu.memory_space<smem>>
    %c16 = arith.constant 16 : index
    %11 = memref.load %arg1[%c16] : memref<21xf32, #tpu.memory_space<smem>>
    %12 = vector.broadcast %7 : f32 to vector<8x128xf32>
    %13 = arith.mulf %1, %12 : vector<8x128xf32>
    %14 = vector.broadcast %8 : f32 to vector<8x128xf32>
    %15 = arith.mulf %3, %14 : vector<8x128xf32>
    %16 = arith.addf %13, %15 : vector<8x128xf32>
    %17 = vector.broadcast %9 : f32 to vector<8x128xf32>
    %18 = arith.mulf %5, %17 : vector<8x128xf32>
    %19 = arith.addf %16, %18 : vector<8x128xf32>
    %20 = vector.broadcast %10 : f32 to vector<8x128xf32>
    %21 = arith.addf %19, %20 : vector<8x128xf32>
    %cst = arith.constant 0.000000e+00 : f32
    %22 = vector.broadcast %cst : f32 to vector<8x128xf32>
    %23 = arith.maximumf %21, %22 : vector<8x128xf32>
    %24 = vector.broadcast %11 : f32 to vector<8x128xf32>
    %25 = arith.mulf %23, %24 : vector<8x128xf32>
    %26 = vector.broadcast %6 : f32 to vector<8x128xf32>
    %27 = arith.addf %25, %26 : vector<8x128xf32>
    %c1_7 = arith.constant 1 : index
    %28 = memref.load %arg1[%c1_7] : memref<21xf32, #tpu.memory_space<smem>>
    %c5 = arith.constant 5 : index
    %29 = memref.load %arg1[%c5] : memref<21xf32, #tpu.memory_space<smem>>
    %c9 = arith.constant 9 : index
    %30 = memref.load %arg1[%c9] : memref<21xf32, #tpu.memory_space<smem>>
    %c13 = arith.constant 13 : index
    %31 = memref.load %arg1[%c13] : memref<21xf32, #tpu.memory_space<smem>>
    %c17 = arith.constant 17 : index
    %32 = memref.load %arg1[%c17] : memref<21xf32, #tpu.memory_space<smem>>
    %33 = vector.broadcast %28 : f32 to vector<8x128xf32>
    %34 = arith.mulf %1, %33 : vector<8x128xf32>
    %35 = vector.broadcast %29 : f32 to vector<8x128xf32>
    %36 = arith.mulf %3, %35 : vector<8x128xf32>
    %37 = arith.addf %34, %36 : vector<8x128xf32>
    %38 = vector.broadcast %30 : f32 to vector<8x128xf32>
    %39 = arith.mulf %5, %38 : vector<8x128xf32>
    %40 = arith.addf %37, %39 : vector<8x128xf32>
    %41 = vector.broadcast %31 : f32 to vector<8x128xf32>
    %42 = arith.addf %40, %41 : vector<8x128xf32>
    %cst_8 = arith.constant 0.000000e+00 : f32
    %43 = vector.broadcast %cst_8 : f32 to vector<8x128xf32>
    %44 = arith.maximumf %42, %43 : vector<8x128xf32>
    %45 = vector.broadcast %32 : f32 to vector<8x128xf32>
    %46 = arith.mulf %44, %45 : vector<8x128xf32>
    %47 = arith.addf %27, %46 : vector<8x128xf32>
    %c2_9 = arith.constant 2 : index
    %48 = memref.load %arg1[%c2_9] : memref<21xf32, #tpu.memory_space<smem>>
    %c6 = arith.constant 6 : index
    %49 = memref.load %arg1[%c6] : memref<21xf32, #tpu.memory_space<smem>>
    %c10 = arith.constant 10 : index
    %50 = memref.load %arg1[%c10] : memref<21xf32, #tpu.memory_space<smem>>
    %c14 = arith.constant 14 : index
    %51 = memref.load %arg1[%c14] : memref<21xf32, #tpu.memory_space<smem>>
    %c18 = arith.constant 18 : index
    %52 = memref.load %arg1[%c18] : memref<21xf32, #tpu.memory_space<smem>>
    %53 = vector.broadcast %48 : f32 to vector<8x128xf32>
    %54 = arith.mulf %1, %53 : vector<8x128xf32>
    %55 = vector.broadcast %49 : f32 to vector<8x128xf32>
    %56 = arith.mulf %3, %55 : vector<8x128xf32>
    %57 = arith.addf %54, %56 : vector<8x128xf32>
    %58 = vector.broadcast %50 : f32 to vector<8x128xf32>
    %59 = arith.mulf %5, %58 : vector<8x128xf32>
    %60 = arith.addf %57, %59 : vector<8x128xf32>
    %61 = vector.broadcast %51 : f32 to vector<8x128xf32>
    %62 = arith.addf %60, %61 : vector<8x128xf32>
    %cst_10 = arith.constant 0.000000e+00 : f32
    %63 = vector.broadcast %cst_10 : f32 to vector<8x128xf32>
    %64 = arith.maximumf %62, %63 : vector<8x128xf32>
    %65 = vector.broadcast %52 : f32 to vector<8x128xf32>
    %66 = arith.mulf %64, %65 : vector<8x128xf32>
    %67 = arith.addf %47, %66 : vector<8x128xf32>
    %c3 = arith.constant 3 : index
    %68 = memref.load %arg1[%c3] : memref<21xf32, #tpu.memory_space<smem>>
    %c7 = arith.constant 7 : index
    %69 = memref.load %arg1[%c7] : memref<21xf32, #tpu.memory_space<smem>>
    %c11 = arith.constant 11 : index
    %70 = memref.load %arg1[%c11] : memref<21xf32, #tpu.memory_space<smem>>
    %c15 = arith.constant 15 : index
    %71 = memref.load %arg1[%c15] : memref<21xf32, #tpu.memory_space<smem>>
    %c19 = arith.constant 19 : index
    %72 = memref.load %arg1[%c19] : memref<21xf32, #tpu.memory_space<smem>>
    %73 = vector.broadcast %68 : f32 to vector<8x128xf32>
    %74 = arith.mulf %1, %73 : vector<8x128xf32>
    %75 = vector.broadcast %69 : f32 to vector<8x128xf32>
    %76 = arith.mulf %3, %75 : vector<8x128xf32>
    %77 = arith.addf %74, %76 : vector<8x128xf32>
    %78 = vector.broadcast %70 : f32 to vector<8x128xf32>
    %79 = arith.mulf %5, %78 : vector<8x128xf32>
    %80 = arith.addf %77, %79 : vector<8x128xf32>
    %81 = vector.broadcast %71 : f32 to vector<8x128xf32>
    %82 = arith.addf %80, %81 : vector<8x128xf32>
    %cst_11 = arith.constant 0.000000e+00 : f32
    %83 = vector.broadcast %cst_11 : f32 to vector<8x128xf32>
    %84 = arith.maximumf %82, %83 : vector<8x128xf32>
    %85 = vector.broadcast %72 : f32 to vector<8x128xf32>
    %86 = arith.mulf %84, %85 : vector<8x128xf32>
    %87 = arith.addf %67, %86 : vector<8x128xf32>
    %c0_12 = arith.constant 0 : index
    %c0_13 = arith.constant 0 : index
    %88 = vector.load %arg3[%c0_12, %c0_13] : memref<8x128xf32, #tpu.memory_space<vmem>>, vector<8x128xf32>
    tpu.vector_store %arg3[%c0_12, %c0_13], %87 {strides = array<i32>} : memref<8x128xf32, #tpu.memory_space<vmem>>, vector<8x128xf32>,
    return
  }
  func.func @transform_0(%arg0: i32) -> i32 {
    %c0_i32 = arith.constant 0 : i32
    %c0_i32_0 = arith.constant 0 : i32
    return %c0_i32 : i32
  }
  func.func @transform_1(%arg0: i32) -> (i32, i32, i32) {
    %c0_i32 = arith.constant 0 : i32
    %c0_i32_0 = arith.constant 0 : i32
    %c0_i32_1 = arith.constant 0 : i32
    return %c0_i32, %arg0, %c0_i32_0 : i32, i32, i32
  }
  func.func @transform_2(%arg0: i32) -> (i32, i32) {
    %c0_i32 = arith.constant 0 : i32
    %c0_i32_0 = arith.constant 0 : i32
    return %arg0, %c0_i32 : i32, i32
  }
}

</mosaic_0001>

<bundles_post_ra>
// kernel: tpu_custom_call.1
= control target key start
LH: loop header
LB: loop body
LE: loop exit
PB: predicated region body
PF: predicated region fallthrough
CT: control target
= control target key end

     0   :  { %7 = vsyncpa [#allocation5], 0  ;;  %s317_s0 = inlined_call_operand.hbm [shape: f32[21], index: 0, kind: input, shape index: {}]   ;;  %s318_s1 = inlined_call_operand.hbm [shape: f32[3,8,128], index: 1, kind: input, shape index: {}]   ;;  %s319_s2 = inlined_call_operand.hbm [shape: f32[8,128], index: 2, kind: output, shape index: {}]  }
   0x1   :  { %8 = vsyncpa [#allocation3], 0 }
   0x2   :  { %9 = vsyncpa [#allocation4], 0  ;;  %s162_s11 = scalar_lea.hbm %s317_s0, 16 }
   0x3   :  { %p163_p0 = scmp.ne.s32.totalorder %s317_s0, %s162_s11  ;;  %p166_p1 = scmp.lt.u32.totalorder %s162_s11, %s317_s0 }
   0x5   :  { %p168_p2 = pnand %p166_p1, %p163_p0 }
   0x7   :  { %171 = shalt.err (!%p168_p2)
}
   0x8   :  { %s222_s16 = smov [#allocation2]   ;;  %s223_s19 = smov [#allocation6]  }
   0x9   :  { %17 = dma.hbm_to_smem %s317_s0, 16, %s222_s16, [#allocation5]  }
   0xa   :  { %s23_s20 = sshll.u32 %s223_s19, 4  ;;  %s172_s23 = scalar_lea.hbm %s318_s1, 384  ;;  %s24_s20 = int_to_ptr.vmem [resolvable:$true] %s23_s20 }
   0xb   :  { %p173_p3 = scmp.ne.s32.totalorder %s318_s1, %s172_s23  ;;  %p176_p4 = scmp.lt.u32.totalorder %s172_s23, %s318_s1 }
   0xd   :  { %p178_p5 = pnand %p176_p4, %p173_p3 }
   0xf   :  { %181 = shalt.err (!%p178_p5)
}
  0x10   :  { %s182_s28 = scalar_lea.vmem %s24_s20, 384  ;;  %p187_p7 = scmp.lt.s32.totalorder %s24_s20, %s24_s20 }
  0x11   :  { %p183_p6 = scmp.ne.s32.totalorder %s24_s20, %s182_s28  ;;  %p188_p8 = scmp.lt.s32.totalorder %s182_s28, %s182_s28 }
  0x13   :  { %p189_p9 = por %p188_p8, %p187_p7 }
  0x15   :  { %p190_p10 = pnand %p189_p9, %p183_p6 }
  0x17   :  { %193 = shalt.err (!%p190_p10)
}
  0x18   :  { %s224_s0 = smov 128   ;;  %s225_s29 = smov 8  }
  0x19   :  { %29 = dma.hbm_to_vmem [thread:$0]  %s318_s1, 384, %s24_s20, [#allocation3], %s224_s0, %s224_s0, %s225_s29  }
  0x1a   :  { %216 = dma.done.wait [#allocation5], 16  }
  0x1b   :  { %217 = vsyncadd [#allocation5], 4294967280 }
  0x1c   :  { %218 = dma.done.wait [#allocation3], 384  }
  0x1d   :  { %219 = vsyncadd [#allocation3], 4294966912 }
  0x1e   :  { %36 = sfence }
  0x1f   :  { %s43_s4 = sld [smem:[#allocation2]]  ;;  %s138_s5 = sld [smem:[#allocation2 + $0x4]]  ;;  %v37_v0 = vld [vmem:[#allocation6] sm:$0xff]  ;;  %v39_v1 = vld [vmem:[#allocation6 + $0x8] sm:$0xff]  ;;  %v41_v2 = vld [vmem:[#allocation6 + $0x10] sm:$0xff] }
  0x20   :  { %s139_s6 = sld [smem:[#allocation2 + $0x8]]  ;;  %s266_s7 = sld [smem:[#allocation2 + $0xc]] }
  0x21   :  { %s268_s8 = sld [smem:[#allocation2 + $0x10]]  ;;  %s142_s9 = sld [smem:[#allocation2 + $0x1]] }
  0x22   :  { %s143_s10 = sld [smem:[#allocation2 + $0x5]]  ;;  %s144_s11 = sld [smem:[#allocation2 + $0x9]] }
  0x23   :  { %s270_s12 = sld [smem:[#allocation2 + $0xd]]  ;;  %s147_s1 = sld [smem:[#allocation2 + $0x2]] }
  0x24   :  { %s148_s13 = sld [smem:[#allocation2 + $0x6]]  ;;  %s272_s14 = sld [smem:[#allocation2 + $0xa]] }
  0x25   :  { %v48_v3 = vstv %s43_s4  ;;  %v50_v4 = vstv %s138_s5  ;;  %s274_s15 = sld [smem:[#allocation2 + $0xe]]  ;;  %s276_s16 = sld [smem:[#allocation2 + $0x14]] }
  0x26   :  { %v49_v5 = vmul.f32 %v48_v3, %v37_v0  ;;  %v51_v6 = vmul.f32 %v50_v4, %v39_v1  ;;  %v53_v7 = vstv %s139_s6  ;;  %s278_s17 = sld [smem:[#allocation2 + $0x3]]  ;;  %s280_s18 = sld [smem:[#allocation2 + $0x7]]  ;;  %v56_v14 = vstv %s266_s7 }
  0x27   :  { %v54_v8 = vmul.f32 %v53_v7, %v41_v2  ;;  %v68_v9 = vstv %s142_s9  ;;  %s282_s19 = sld [smem:[#allocation2 + $0xb]]  ;;  %s284_s20 = sld [smem:[#allocation2 + $0x11]]  ;;  %v59_v18 = vstv %s268_s8 }
  0x28   :  { %v52_v10 = vadd.f32 %v51_v6, %v49_v5  ;;  %v69_v11 = vmul.f32 %v68_v9, %v37_v0  ;;  %v70_v12 = vstv %s143_s10  ;;  %v73_v13 = vstv %s144_s11  ;;  %s287_s21 = sld [smem:[#allocation2 + $0xf]]  ;;  %s290_s22 = sld [smem:[#allocation2 + $0x12]] }
  0x29   :  { %v71_v15 = vmul.f32 %v70_v12, %v39_v1  ;;  %v74_v16 = vmul.f32 %v73_v13, %v41_v2  ;;  %v87_v19 = vstv %s147_s1  ;;  %v76_v26 = vstv %s270_s12  ;;  %s295_s23 = sld [smem:[#allocation2 + $0x13]]  ;;  %s226_s24 = smov [#allocation7]  }
  0x2a   :  { %v55_v17 = vadd.f32 %v54_v8, %v52_v10  ;;  %v89_v20 = vstv %s148_s13  ;;  %v88_v22 = vmul.f32 %v87_v19, %v37_v0  ;;  %v92_v24 = vstv %s272_s14  ;;  %s127_s25 = sshll.u32 %s226_s24, 4  ;;  %s128_s25 = int_to_ptr.vmem [resolvable:$true] %s127_s25 }
  0x2b   :  { %v72_v21 = vadd.f32 %v71_v15, %v69_v11  ;;  %v90_v23 = vmul.f32 %v89_v20, %v39_v1  ;;  %v93_v27 = vmul.f32 %v92_v24, %v41_v2  ;;  %v95_v28 = vstv %s274_s15  ;;  %s194_s26 = scalar_lea.vmem %s128_s25, 128  ;;  %p199_p12 = scmp.lt.s32.totalorder %s128_s25, %s128_s25 }
  0x2c   :  { %v57_v25 = vadd.f32 %v56_v14, %v55_v17  ;;  %v106_v31 = vstv %s278_s17  ;;  %v108_v32 = vstv %s280_s18  ;;  %v61_v37 = vstv %s276_s16  ;;  %p195_p11 = scmp.ne.s32.totalorder %s128_s25, %s194_s26  ;;  %p200_p13 = scmp.lt.s32.totalorder %s194_s26, %s194_s26 }
  0x2d   :  { %v75_v29 = vadd.f32 %v74_v16, %v72_v21  ;;  %v91_v30 = vadd.f32 %v90_v23, %v88_v22  ;;  %v107_v34 = vmul.f32 %v106_v31, %v37_v0  ;;  %v109_v35 = vmul.f32 %v108_v32, %v39_v1 }
  0x2e   :  { %v58_v33 = vmax.f32 %v57_v25, 0.0  ;;  %v111_v36 = vstv %s282_s19  ;;  %v79_v42 = vstv %s284_s20  ;;  %v114_v46 = vstv %s287_s21  ;;  %p201_p0 = por %p200_p13, %p199_p12 }
  0x2f   :  { %v77_v38 = vadd.f32 %v76_v26, %v75_v29  ;;  %v94_v39 = vadd.f32 %v93_v27, %v91_v30  ;;  %v112_v40 = vmul.f32 %v111_v36, %v41_v2  ;;  %v110_v43 = vadd.f32 %v109_v35, %v107_v34 }
  0x30   :  { %v60_v41 = vmul.f32 %v59_v18, %v58_v33  ;;  %v98_v48 = vstv %s290_s22  ;;  %v117_v55 = vstv %s295_s23  ;;  %p202_p1 = pnand %p201_p0, %p195_p11 }
  0x31   :  { %v78_v44 = vmax.f32 %v77_v38, 0.0  ;;  %v96_v45 = vadd.f32 %v95_v28, %v94_v39  ;;  %v113_v49 = vadd.f32 %v112_v40, %v110_v43 }
  0x32   :  { %v62_v47 = vadd.f32 %v61_v37, %v60_v41 }
  0x33   :  { %v80_v50 = vmul.f32 %v79_v42, %v78_v44  ;;  %v97_v51 = vmax.f32 %v96_v45, 0.0  ;;  %v115_v52 = vadd.f32 %v114_v46, %v113_v49 }
  0x35   :  { %v81_v53 = vadd.f32 %v80_v50, %v62_v47  ;;  %v99_v54 = vmul.f32 %v98_v48, %v97_v51  ;;  %v116_v56 = vmax.f32 %v115_v52, 0.0 }
  0x37   :  { %v100_v57 = vadd.f32 %v99_v54, %v81_v53  ;;  %v118_v58 = vmul.f32 %v117_v55, %v116_v56 }
  0x39   :  { %v119_v59 = vadd.f32 %v118_v58, %v100_v57 }
  0x3b   :  { %120 = vst [vmem:[#allocation7] sm:$0xff] %v119_v59 }
  0x3c   :  { %205 = shalt.err (!%p202_p1)
}
  0x3d   :  { %s206_s0 = scalar_lea.hbm %s319_s2, 128 }
  0x3e   :  { %p207_p2 = scmp.ne.s32.totalorder %s319_s2, %s206_s0  ;;  %p210_p3 = scmp.lt.u32.totalorder %s206_s0, %s319_s2 }
  0x40   :  { %p212_p4 = pnand %p210_p3, %p207_p2 }
  0x42   :  { %215 = shalt.err (!%p212_p4)
}
  0x43   :  { %130 = dma.vmem_to_hbm [thread:$0]  %s128_s25, 128, %s319_s2, [#allocation4]  }
  0x44   :  { %220 = dma.done.wait [#allocation4], 128  }
  0x45   :  { %221 = vsyncadd [#allocation4], 4294967168 }
  0x46   :  { %134 = vsyncpa [#allocation3], 1 }
  0x47   :  { %135 = vsyncpa [#allocation4], 1 }
  0x48   :  { %136 = vsyncpa [#allocation5], 1 }

</bundles_post_ra>
